<compile_context>
chip_gen: v7x
topology: tpu7x:2x2x1
jax: 0.10.0
libtpu: 0.0.40
codegen_flags: <defaults>
</compile_context>

<pallas_src>
import functools

import jax
import jax.numpy as jnp
from jax.experimental import pallas as pl
from jax.experimental.pallas import tpu as pltpu


_SUB_ROWS_MAX = 256     # rows processed per in-kernel sub-chunk (bounds f32 temporaries)
_INTERM_ARRAYS = 10     # ~live f32 (sub_rows, C) temporaries inside one sub-chunk
_MAX_ROWS = 2048        # row-tile ceiling (diminishing returns past ~1024)


def _vmem_budgets():
    """(vmem_limit_bytes, streaming-input budget) per TPU generation."""
    try:
        cap = int(getattr(pltpu.get_tpu_info(), "vmem_capacity_bytes", 64 << 20))
    except Exception:
        cap = 64 << 20                       # unknown -> assume smallest (v7x-class)
    if cap <= (80 << 20):                    # v7x: 64 MiB per TensorCore
        return 48 << 20, 28 << 20
    return 64 << 20, 40 << 20                # v5e / v6e: 128 MiB physical VMEM


def _pick_tiling(n, c, itemsize, row_mult):
    """Returns (block_n, sub_rows, padded_n, vmem_limit_bytes)."""
    vmem_limit, budget = _vmem_budgets()

    # Sub-chunk rows: bound the f32 working set independent of block_n.
    sub = _SUB_ROWS_MAX
    while sub > row_mult and _INTERM_ARRAYS * sub * c * 4 > budget // 2:
        sub //= 2
    sub = max(sub, row_mult)

    if n <= sub:
        return n, n, n, vmem_limit           # single tile, single chunk, no padding

    # Row-tile cap from the double-buffered input streams (dtype-aware) after
    # reserving space for the bounded sub-chunk intermediates.
    interm = _INTERM_ARRAYS * sub * c * 4
    per_row = 2 * 2 * itemsize * c + 2 * 2 * 4      # s+t (2 bufs each) + int32 targets
    cap_rows = (budget - interm) // per_row
    cap_rows = int(max(sub, min(cap_rows, _MAX_ROWS)))
    cap_rows = (cap_rows // sub) * sub

    padded_n = ((n + sub - 1) // sub) * sub          # pad N to a sub-chunk multiple
    block_n = sub
    bn = min(cap_rows, padded_n)
    while bn >= sub:                                 # largest multiple of `sub` tile
        if padded_n % bn == 0:                       # that evenly tiles padded_n
            block_n = bn
            break
        bn -= sub
    return block_n, sub, padded_n, vmem_limit


def _bkd_kernel(s_ref, t_ref, tgt_ref, *rest, inv_t, has_weight,
                block_n, sub_rows, num_sub, n_valid, needs_mask):
    if has_weight:
        w_ref, kd_ref, ce_ref = rest
    else:
        w_ref = None
        kd_ref, ce_ref = rest

    c = s_ref.shape[-1]

    # Hoisted loop-invariant values (JAX does not CSE broadcast_in_dim / iota).
    col = jax.lax.broadcasted_iota(jnp.int32, (1, c), 1)            # (1, C) class ids
    w = w_ref[...].astype(jnp.float32) if has_weight else None      # (1, C)
    if needs_mask:
        tile_base = pl.program_id(0) * block_n
        row_iota = jax.lax.broadcasted_iota(jnp.int32, (sub_rows, 1), 0)

    def chunk(r0):
        xs = s_ref[pl.ds(r0, sub_rows), :].astype(jnp.float32)      # (SUB, C) student
        xt = t_ref[pl.ds(r0, sub_rows), :].astype(jnp.float32)      # (SUB, C) teacher
        tgt = tgt_ref[pl.ds(r0, sub_rows), :]                       # (SUB, 1) int32

        # ---- teacher: temperature-softened (optionally re-weighted) probabilities ----
        zt_c = xt * inv_t
        zt_c = zt_c - jnp.max(zt_c, axis=-1, keepdims=True)
        et = jnp.exp(zt_c)
        sum_t = jnp.sum(et, axis=-1, keepdims=True)                  # (SUB, 1)
        pt = et * pl.reciprocal(sum_t)                               # per-row recip, exact
        if has_weight:
            ptw = pt * w
            pt = ptw * pl.reciprocal(jnp.sum(ptw, axis=-1, keepdims=True))
            log_pt = jnp.log(jnp.where(pt > 0.0, pt, 1.0))           # xlogy(0, .) == 0
        else:
            log_pt = zt_c - jnp.log(sum_t)                           # log_softmax(out_t / T)

        # ---- student: shared max for log_softmax(out_s/T) and for CE on out_s ----
        m0 = jnp.max(xs, axis=-1, keepdims=True)                     # (SUB, 1)
        xs_c = xs - m0
        zs_c = xs_c * inv_t                                          # == zs - max(zs)
        log_ps = zs_c - jnp.log(jnp.sum(jnp.exp(zs_c), axis=-1, keepdims=True))

        kd_elem = pt * (log_pt - log_ps)                             # (SUB, C)

        # ---- cross-entropy on the unscaled student logits (reuses m0 / xs_c) ----
        lse0 = jnp.log(jnp.sum(jnp.exp(xs_c), axis=-1, keepdims=True))   # lse - m0
        tgt_logit = jnp.sum(jnp.where(col == tgt, xs_c, 0.0),
                            axis=-1, keepdims=True)                  # xs_c[target]
        ce_rows = lse0 - tgt_logit                                    # (SUB, 1)

        if needs_mask:
            valid = (tile_base + r0 + row_iota) < n_valid             # (SUB, 1)
            kd_elem = jnp.where(valid, kd_elem, 0.0)
            ce_rows = jnp.where(valid, ce_rows, 0.0)

        kd_part = jnp.sum(kd_elem, axis=0, keepdims=True).reshape(1, 1, c)
        ce_part = jnp.sum(ce_rows, axis=0, keepdims=True)             # (1, 1)
        return kd_part, ce_part

    if num_sub == 1:
        kd_part, ce_part = chunk(0)
        kd_ref[...] = kd_part
        ce_ref[...] = jnp.broadcast_to(ce_part.reshape(1, 1, 1), ce_ref.shape)
    else:
        kd_ref[...] = jnp.zeros_like(kd_ref)

        def body(j, ce_acc):
            r0 = pl.multiple_of(j * sub_rows, sub_rows)
            kd_part, ce_part = chunk(r0)
            kd_ref[...] += kd_part
            return ce_acc + ce_part

        ce_acc = jax.lax.fori_loop(0, num_sub, body,
                                   jnp.zeros((1, 1), jnp.float32), unroll=True)
        ce_ref[...] = jnp.broadcast_to(ce_acc.reshape(1, 1, 1), ce_ref.shape)


def bkd_loss_tpu(out_s, out_t, target, alpha, T, weight=None):
    """BKDLoss.forward. out_s/out_t: (N, C) float; target: (N,) int. Returns (loss, kd)."""
    n, c = out_s.shape
    itemsize = max(jnp.dtype(out_s.dtype).itemsize, jnp.dtype(out_t.dtype).itemsize)
    row_mult = 16 if itemsize < 4 else 8              # bf16 sublane packing
    block_n, sub_rows, padded_n, vmem_limit = _pick_tiling(n, c, itemsize, row_mult)
    num_sub = block_n // sub_rows
    num_tiles = padded_n // block_n
    needs_mask = padded_n != n

    if needs_mask:                                    # pad + mask instead of giant tile
        pad = padded_n - n
        out_s = jnp.pad(out_s, ((0, pad), (0, 0)))
        out_t = jnp.pad(out_t, ((0, pad), (0, 0)))
        target = jnp.pad(target, ((0, pad),))
    tgt2 = target.reshape(padded_n, 1).astype(jnp.int32)

    has_weight = weight is not None
    kernel = functools.partial(
        _bkd_kernel, inv_t=float(1.0 / T), has_weight=has_weight,
        block_n=block_n, sub_rows=sub_rows, num_sub=num_sub,
        n_valid=n, needs_mask=needs_mask)

    in_specs = [
        pl.BlockSpec((block_n, c), lambda i: (i, 0)),      # student logits tile
        pl.BlockSpec((block_n, c), lambda i: (i, 0)),      # teacher logits tile
        pl.BlockSpec((block_n, 1), lambda i: (i, 0)),      # targets tile
    ]
    args = [out_s, out_t, tgt2]
    if has_weight:
        in_specs.append(pl.BlockSpec((1, c), lambda i: (0, 0)))   # class weights (broadcast)
        args.append(jnp.asarray(weight, jnp.float32).reshape(1, c))

    kd_part, ce_part = pl.pallas_call(
        kernel,
        out_shape=(jax.ShapeDtypeStruct((num_tiles, 1, c), jnp.float32),    # per-tile KD sums
                   jax.ShapeDtypeStruct((num_tiles, 1, 128), jnp.float32)), # per-tile CE (lane-dense)
        grid_spec=pltpu.PrefetchScalarGridSpec(
            num_scalar_prefetch=0,
            grid=(num_tiles,),
            in_specs=in_specs,
            out_specs=[pl.BlockSpec((1, 1, c), lambda i: (i, 0, 0)),
                       pl.BlockSpec((1, 1, 128), lambda i: (i, 0, 0))],
        ),
        compiler_params=pltpu.CompilerParams(
            dimension_semantics=("parallel",),     # independent partials -> megacore-friendly
            vmem_limit_bytes=vmem_limit),
    )(*args)

    # Tiny final reductions in plain JAX (keeps the grid fully parallel).
    inv_n = 1.0 / n
    kd = kd_part.reshape(num_tiles, c).sum(axis=0) * inv_n            # (C,) == kd.mean(dim=0)
    kd_loss = kd.sum() * (T * T)
    ce_loss = ce_part[:, 0, 0].sum() * inv_n
    loss = alpha * kd_loss + ce_loss
    return loss, kd


def _bkd_ref(out_s, out_t, target, alpha, T, weight=None):
    """Pure-JAX reference matching the PyTorch BKDLoss.forward."""
    log_ps = jax.nn.log_softmax(out_s.astype(jnp.float32) / T, axis=1)
    pt = jax.nn.softmax(out_t.astype(jnp.float32) / T, axis=1)
    if weight is not None:
        pt = pt * weight.reshape(1, -1)
        pt = pt / pt.sum(axis=1, keepdims=True)
    kd_elem = jnp.where(pt > 0, pt * (jnp.log(jnp.where(pt > 0, pt, 1.0)) - log_ps), 0.0)
    kd = kd_elem.mean(axis=0)
    kd_loss = kd.sum() * T * T
    logp = jax.nn.log_softmax(out_s.astype(jnp.float32), axis=1)
    ce_loss = -jnp.mean(jnp.take_along_axis(logp, target.reshape(-1, 1), axis=1))
    return alpha * kd_loss + ce_loss, kd


if __name__ == "__main__":
    key = jax.random.PRNGKey(0)
    k1, k2, k3, k4, k5 = jax.random.split(key, 5)
    N, C = 32, 128
    T = 2.0
    alpha = 0.7

    out_s = jax.random.normal(k1, (N, C), dtype=jnp.float32)
    out_t = jax.random.normal(k2, (N, C), dtype=jnp.float32)
    target = jax.random.randint(k3, (N,), 0, C, dtype=jnp.int32)

    # weight=None path (default BKDLoss config)
    loss, kd = jax.block_until_ready(bkd_loss_tpu(out_s, out_t, target, alpha, T))
    loss_r, kd_r = _bkd_ref(out_s, out_t, target, alpha, T)
    assert jnp.allclose(loss, loss_r, rtol=1e-5, atol=1e-5), (loss, loss_r)
    assert jnp.allclose(kd, kd_r, rtol=1e-4, atol=1e-6)

    # per-class-weight path (BKDLoss(weight=...))
    w = jax.random.uniform(k4, (C,), jnp.float32, minval=0.5, maxval=1.5)
    loss_w, kd_w = jax.block_until_ready(bkd_loss_tpu(out_s, out_t, target, alpha, T, weight=w))
    loss_wr, kd_wr = _bkd_ref(out_s, out_t, target, alpha, T, weight=w)
    assert jnp.allclose(loss_w, loss_wr, rtol=1e-5, atol=1e-5), (loss_w, loss_wr)
    assert jnp.allclose(kd_w, kd_wr, rtol=1e-4, atol=1e-6)

    # non-divisible N: exercises the pad+mask path and the in-kernel sub-chunk loop
    N2 = 300
    out_s2 = jax.random.normal(k5, (N2, C), dtype=jnp.float32)
    out_t2 = jax.random.normal(k1, (N2, C), dtype=jnp.float32)
    target2 = jax.random.randint(k2, (N2,), 0, C, dtype=jnp.int32)
    loss2, kd2 = jax.block_until_ready(bkd_loss_tpu(out_s2, out_t2, target2, alpha, T))
    loss2_r, kd2_r = _bkd_ref(out_s2, out_t2, target2, alpha, T)
    assert jnp.allclose(loss2, loss2_r, rtol=2e-5, atol=1e-5), (loss2, loss2_r)
    assert jnp.allclose(kd2, kd2_r, rtol=1e-4, atol=1e-6)

    print("KERNEL_OK")
</pallas_src>

<mosaic_0001>
module attributes {stable_mosaic.version = 11 : i64} {
  func.func @_bkd_kernel(%arg0: i32, %arg1: memref<32x128xf32, #tpu.memory_space<vmem>>, %arg2: memref<32x128xf32, #tpu.memory_space<vmem>>, %arg3: memref<32x1xi32, #tpu.memory_space<vmem>>, %arg4: memref<1x1x128xf32, #tpu.memory_space<vmem>>, %arg5: memref<1x1x128xf32, #tpu.memory_space<vmem>>) attributes {dimension_semantics = [#tpu.dimension_semantics<parallel>], iteration_bounds = array<i64: 1>, scalar_prefetch = 0 : i64, scratch_operands = 0 : i64, tpu.core_type = #tpu.core_type<tc>, window_params = [{transform_indices = @transform_0, window_bounds = array<i64: 32, 128>}, {transform_indices = @transform_1, window_bounds = array<i64: 32, 128>}, {transform_indices = @transform_2, window_bounds = array<i64: 32, 1>}, {transform_indices = @transform_3, window_bounds = array<i64: 1, 1, 128>}, {transform_indices = @transform_4, window_bounds = array<i64: 1, 1, 128>}]} {
    %0 = tpu.iota {dimensions = array<i32: 1>} : vector<1x128xi32>
    %c0 = arith.constant 0 : index
    %c0_0 = arith.constant 0 : index
    %1 = vector.load %arg1[%c0, %c0_0] : memref<32x128xf32, #tpu.memory_space<vmem>>, vector<32x128xf32>
    %c0_1 = arith.constant 0 : index
    %c0_2 = arith.constant 0 : index
    %2 = vector.load %arg2[%c0_1, %c0_2] : memref<32x128xf32, #tpu.memory_space<vmem>>, vector<32x128xf32>
    %c0_3 = arith.constant 0 : index
    %c0_4 = arith.constant 0 : index
    %3 = vector.load %arg3[%c0_3, %c0_4] : memref<32x1xi32, #tpu.memory_space<vmem>>, vector<32x1xi32>
    %cst = arith.constant 5.000000e-01 : f32
    %4 = vector.broadcast %cst : f32 to vector<32x128xf32>
    %5 = arith.mulf %2, %4 : vector<32x128xf32>
    %cst_5 = arith.constant dense<0xFF800000> : vector<32xf32>
    %6 = vector.multi_reduction <maximumf>, %5, %cst_5 [1] : vector<32x128xf32> to vector<32xf32>
    %7 = vector.shape_cast %6 : vector<32xf32> to vector<32x1xf32>
    %8 = vector.broadcast %7 : vector<32x1xf32> to vector<32x128xf32>
    %9 = arith.subf %5, %8 : vector<32x128xf32>
    %10 = math.exp %9 : vector<32x128xf32>
    %cst_6 = arith.constant dense<0.000000e+00> : vector<32xf32>
    %11 = vector.multi_reduction <add>, %10, %cst_6 [1] : vector<32x128xf32> to vector<32xf32>
    %12 = vector.shape_cast %11 : vector<32xf32> to vector<32x1xf32>
    %13 = tpu.reciprocal %12 : vector<32x1xf32> -> vector<32x1xf32>
    %14 = vector.broadcast %13 : vector<32x1xf32> to vector<32x128xf32>
    %15 = arith.mulf %10, %14 : vector<32x128xf32>
    %16 = math.log %12 : vector<32x1xf32>
    %17 = vector.broadcast %16 : vector<32x1xf32> to vector<32x128xf32>
    %18 = arith.subf %9, %17 : vector<32x128xf32>
    %cst_7 = arith.constant dense<0xFF800000> : vector<32xf32>
    %19 = vector.multi_reduction <maximumf>, %1, %cst_7 [1] : vector<32x128xf32> to vector<32xf32>
    %20 = vector.shape_cast %19 : vector<32xf32> to vector<32x1xf32>
    %21 = vector.broadcast %20 : vector<32x1xf32> to vector<32x128xf32>
    %22 = arith.subf %1, %21 : vector<32x128xf32>
    %cst_8 = arith.constant 5.000000e-01 : f32
    %23 = vector.broadcast %cst_8 : f32 to vector<32x128xf32>
    %24 = arith.mulf %22, %23 : vector<32x128xf32>
    %25 = math.exp %24 : vector<32x128xf32>
    %cst_9 = arith.constant dense<0.000000e+00> : vector<32xf32>
    %26 = vector.multi_reduction <add>, %25, %cst_9 [1] : vector<32x128xf32> to vector<32xf32>
    %27 = vector.shape_cast %26 : vector<32xf32> to vector<32x1xf32>
    %28 = math.log %27 : vector<32x1xf32>
    %29 = vector.broadcast %28 : vector<32x1xf32> to vector<32x128xf32>
    %30 = arith.subf %24, %29 : vector<32x128xf32>
    %31 = arith.subf %18, %30 : vector<32x128xf32>
    %32 = arith.mulf %15, %31 : vector<32x128xf32>
    %33 = math.exp %22 : vector<32x128xf32>
    %cst_10 = arith.constant dense<0.000000e+00> : vector<32xf32>
    %34 = vector.multi_reduction <add>, %33, %cst_10 [1] : vector<32x128xf32> to vector<32xf32>
    %35 = vector.shape_cast %34 : vector<32xf32> to vector<32x1xf32>
    %36 = math.log %35 : vector<32x1xf32>
    %37 = vector.broadcast %0 : vector<1x128xi32> to vector<32x128xi32>
    %38 = vector.broadcast %3 : vector<32x1xi32> to vector<32x128xi32>
    %39 = arith.cmpi eq, %37, %38 : vector<32x128xi32>
    %cst_11 = arith.constant 0.000000e+00 : f32
    %40 = vector.broadcast %cst_11 : f32 to vector<32x128xf32>
    %41 = arith.select %39, %22, %40 : vector<32x128xi1>, vector<32x128xf32>
    %cst_12 = arith.constant dense<0.000000e+00> : vector<32xf32>
    %42 = vector.multi_reduction <add>, %41, %cst_12 [1] : vector<32x128xf32> to vector<32xf32>
    %43 = vector.shape_cast %42 : vector<32xf32> to vector<32x1xf32>
    %44 = arith.subf %36, %43 : vector<32x1xf32>
    %cst_13 = arith.constant dense<0.000000e+00> : vector<128xf32>
    %45 = vector.multi_reduction <add>, %32, %cst_13 [0] : vector<32x128xf32> to vector<128xf32>
    %46 = vector.shape_cast %45 : vector<128xf32> to vector<1x128xf32>
    %47 = vector.shape_cast %46 : vector<1x128xf32> to vector<1x1x128xf32>
    %cst_14 = arith.constant dense<0.000000e+00> : vector<1xf32>
    %48 = vector.multi_reduction <add>, %44, %cst_14 [0] : vector<32x1xf32> to vector<1xf32>
    %49 = vector.shape_cast %48 : vector<1xf32> to vector<1x1xf32>
    %c0_15 = arith.constant 0 : index
    %c0_16 = arith.constant 0 : index
    %c0_17 = arith.constant 0 : index
    %50 = vector.load %arg4[%c0_15, %c0_16, %c0_17] : memref<1x1x128xf32, #tpu.memory_space<vmem>>, vector<1x1x128xf32>
    tpu.vector_store %arg4[%c0_15, %c0_16, %c0_17], %47 {strides = array<i32>} : memref<1x1x128xf32, #tpu.memory_space<vmem>>, vector<1x1x128xf32>,
    %51 = vector.shape_cast %49 : vector<1x1xf32> to vector<1x1x1xf32>
    %52 = vector.shape_cast %51 : vector<1x1x1xf32> to vector<1x1x1xf32>
    %53 = vector.broadcast %52 : vector<1x1x1xf32> to vector<1x1x128xf32>
    %c0_18 = arith.constant 0 : index
    %c0_19 = arith.constant 0 : index
    %c0_20 = arith.constant 0 : index
    %54 = vector.load %arg5[%c0_18, %c0_19, %c0_20] : memref<1x1x128xf32, #tpu.memory_space<vmem>>, vector<1x1x128xf32>
    tpu.vector_store %arg5[%c0_18, %c0_19, %c0_20], %53 {strides = array<i32>} : memref<1x1x128xf32, #tpu.memory_space<vmem>>, vector<1x1x128xf32>,
    return
  }
  func.func @transform_0(%arg0: i32) -> (i32, i32) {
    %c0_i32 = arith.constant 0 : i32
    %c0_i32_0 = arith.constant 0 : i32
    return %arg0, %c0_i32 : i32, i32
  }
  func.func @transform_1(%arg0: i32) -> (i32, i32) {
    %c0_i32 = arith.constant 0 : i32
    %c0_i32_0 = arith.constant 0 : i32
    return %arg0, %c0_i32 : i32, i32
  }
  func.func @transform_2(%arg0: i32) -> (i32, i32) {
    %c0_i32 = arith.constant 0 : i32
    %c0_i32_0 = arith.constant 0 : i32
    return %arg0, %c0_i32 : i32, i32
  }
  func.func @transform_3(%arg0: i32) -> (i32, i32, i32) {
    %c0_i32 = arith.constant 0 : i32
    %c0_i32_0 = arith.constant 0 : i32
    %c0_i32_1 = arith.constant 0 : i32
    return %arg0, %c0_i32, %c0_i32_0 : i32, i32, i32
  }
  func.func @transform_4(%arg0: i32) -> (i32, i32, i32) {
    %c0_i32 = arith.constant 0 : i32
    %c0_i32_0 = arith.constant 0 : i32
    %c0_i32_1 = arith.constant 0 : i32
    return %arg0, %c0_i32, %c0_i32_0 : i32, i32, i32
  }
}

</mosaic_0001>

<bundles_post_ra>
// kernel: tpu_custom_call.1
= control target key start
LH: loop header
LB: loop body
LE: loop exit
PB: predicated region body
PF: predicated region fallthrough
CT: control target
= control target key end

     0   :  { %10 = vsyncpa [#allocation3], 0  ;;  %s548_s0 = inlined_call_operand.vmem [shape: f32[32,128], index: 0, kind: input, shape index: {}]   ;;  %s549_s1 = inlined_call_operand.hbm [shape: f32[32,128], index: 1, kind: input, shape index: {}]   ;;  %s550_s2 = inlined_call_operand.vmem [shape: s32[32,1], index: 2, kind: input, shape index: {}]   ;;  %s551_s3 = inlined_call_operand.hbm [shape: f32[1,1,128], index: 3, kind: output, shape index: {0}]   ;;  %s552_s4 = inlined_call_operand.hbm [shape: f32[1,1,128], index: 4, kind: output, shape index: {1}]  }
   0x1   :  { %11 = vsyncpa [#allocation4], 0 }
   0x2   :  { %12 = vsyncpa [#allocation7], 0  ;;  %s391_s15 = smov [#allocation2]   ;;  %s319_s19 = scalar_lea.hbm %s549_s1, 512 }
   0x3   :  { %s20_s16 = sshll.u32 %s391_s15, 4  ;;  %p320_p0 = scmp.ne.s32.totalorder %s549_s1, %s319_s19  ;;  %s21_s16 = int_to_ptr.vmem [resolvable:$true] %s20_s16 }
   0x4   :  { %p323_p1 = scmp.lt.u32.totalorder %s319_s19, %s549_s1 }
   0x6   :  { %p325_p2 = pnand %p323_p1, %p320_p0 }
   0x8   :  { %328 = shalt.err (!%p325_p2)
}
   0x9   :  { %s329_s24 = scalar_lea.vmem %s21_s16, 512  ;;  %p334_p4 = scmp.lt.s32.totalorder %s21_s16, %s21_s16 }
   0xa   :  { %p330_p3 = scmp.ne.s32.totalorder %s21_s16, %s329_s24  ;;  %p335_p5 = scmp.lt.s32.totalorder %s329_s24, %s329_s24 }
   0xc   :  { %p336_p6 = por %p335_p5, %p334_p4 }
   0xe   :  { %p337_p7 = pnand %p336_p6, %p330_p3 }
  0x10   :  { %340 = shalt.err (!%p337_p7)
}
  0x11   :  { %s392_s25 = smov 128   ;;  %s393_s26 = smov 8  }
  0x12   :  { %26 = dma.hbm_to_vmem [thread:$0]  %s549_s1, 512, %s21_s16, [#allocation3], %s392_s25, %s392_s25, %s393_s26  }
  0x13   :  { %385 = dma.done.wait [#allocation3], 512  }
  0x14   :  { %386 = vsyncadd [#allocation3], 4294966784  ;;  %v394_v0 = vmov 0   ;;  %v34_v1 = vld [vmem:[%s548_s0] sm:$0xff]  ;;  %v39_v4 = vld [vmem:[#allocation2 + $0x8] sm:$0xff]  ;;  %v32_v53 = vlaneseq  ;;  %s396_s18 = smov [#allocation6]  }
  0x15   :  { %262 = vset.pattern.permute.xlu1 %v394_v0  ;;  %261 = vset.pattern.permute.xlu0 %v394_v0  ;;  %v38_v2 = vld [vmem:[#allocation2] sm:$0xff]  ;;  %v35_v5 = vld [vmem:[%s548_s0 + $0x8] sm:$0xff]  ;;  %v47_v6 = vmul.f32 0.5, %v39_v4  ;;  %v40_v7 = vld [vmem:[#allocation2 + $0x10] sm:$0xff]  ;;  %s242_s19 = sshll.u32 %s396_s18, 4  ;;  %s516_s19 = int_to_ptr.vmem [resolvable:$true] %s242_s19 }
  0x16   :  { %98 = vmax.xlane.f32.xlu0 %v34_v1  ;;  %v46_v3 = vmul.f32 0.5, %v38_v2  ;;  %v36_v8 = vld [vmem:[%s548_s0 + $0x10] sm:$0xff]  ;;  %v48_v9 = vmul.f32 0.5, %v40_v7  ;;  %v41_v10 = vld [vmem:[#allocation2 + $0x18] sm:$0xff]  ;;  %v43_v13 = vld [vmem:[%s550_s2 + $0x8] sm:$0xff]  ;;  %v33_v59 = vand.u32 127, %v32_v53 }
  0x17   :  { %v37_v11 = vld [vmem:[%s548_s0 + $0x18] sm:$0xff]  ;;  %v49_v12 = vmul.f32 0.5, %v41_v10  ;;  %v42_v14 = vld [vmem:[%s550_s2] sm:$0xff]  ;;  %v44_v15 = vld [vmem:[%s550_s2 + $0x10] sm:$0xff] }
  0x18   :  { %50 = vmax.xlane.f32.xlu1 %v46_v3  ;;  %v45_v16 = vld [vmem:[%s550_s2 + $0x18] sm:$0xff]  ;;  %s395_s2 = smov [#allocation5]  }
  0x19   :  { %s232_s17 = sshll.u32 %s395_s2, 4  ;;  %s233_s17 = int_to_ptr.vmem [resolvable:$true] %s232_s17 }
  0x1a   :  { %100 = vmax.xlane.f32.xlu0 %v35_v5  ;;  %s341_s20 = scalar_lea.vmem %s233_s17, 16  ;;  %s345_s21 = scalar_lea.vmem %s233_s17, 32 }
  0x1b   :  { %p342_p8 = scmp.ne.s32.totalorder %s233_s17, %s341_s20  ;;  %p346_p9 = scmp.lt.s32.totalorder %s233_s17, %s233_s17 }
  0x1c   :  { %52 = vmax.xlane.f32.xlu1 %v47_v6  ;;  %p347_p10 = scmp.lt.s32.totalorder %s345_s21, %s341_s20 }
  0x1e   :  { %102 = vmax.xlane.f32.xlu0 %v36_v8  ;;  %p348_p11 = por %p347_p10, %p346_p9 }
  0x20   :  { %54 = vmax.xlane.f32.xlu1 %v48_v9  ;;  %p349_p12 = pnand %p348_p11, %p342_p8 }
  0x22   :  { %104 = vmax.xlane.f32.xlu0 %v37_v11 }
  0x24   :  { %56 = vmax.xlane.f32.xlu1 %v49_v12 }
  0x35   :  { %178 = vperm.xlu1 %262, %v43_v13  }
  0x38   :  { %175 = vperm.xlu0 %261, %v42_v14  }
  0x39   :  { %181 = vperm.xlu1 %262, %v44_v15  }
  0x3d   :  { %184 = vperm.xlu1 %262, %v45_v16  }
  0xa3   :  { %v99_v17 = vpop.xlane.xlu0 %98 }
  0xa4   :  { %v458_v18 = vsub.f32 %v34_v1, %v99_v17 }
  0xa5   :  { %v51_v19 = vpop.xlane.xlu1 %50 }
  0xa6   :  { %v150_v20 = vmul.f32 1.442695, %v458_v18  ;;  %v461_v21 = vsub.f32 %v46_v3, %v51_v19  ;;  %v470_v28 = vmul.f32 0.5, %v458_v18 }
  0xa7   :  { %v101_v22 = vpop.xlane.xlu0 %100 }
  0xa8   :  { %263 = vpow2.f32 %v150_v20  ;;  %v463_v23 = vsub.f32 %v35_v5, %v101_v22  ;;  %v62_v25 = vmul.f32 1.442695, %v461_v21  ;;  %v114_v33 = vmul.f32 1.442695, %v470_v28 }
  0xa9   :  { %v53_v24 = vpop.xlane.xlu1 %52 }
  0xaa   :  { %v152_v26 = vmul.f32 1.442695, %v463_v23  ;;  %v467_v27 = vsub.f32 %v47_v6, %v53_v24  ;;  %v474_v31 = vmul.f32 0.5, %v463_v23 }
  0xab   :  { %v103_v32 = vpop.xlane.xlu0 %102 }
  0xac   :  { %265 = vpow2.f32 %v152_v26  ;;  %v64_v29 = vmul.f32 1.442695, %v467_v27  ;;  %v108_v34 = vsub.f32 %v36_v8, %v103_v32  ;;  %v116_v39 = vmul.f32 1.442695, %v474_v31 }
  0xad   :  { %v55_v30 = vpop.xlane.xlu1 %54  ;;  %267 = vpow2.f32 %v62_v25 }
  0xae   :  { %269 = vpow2.f32 %v64_v29  ;;  %v477_v37 = vsub.f32 %v48_v9, %v55_v30  ;;  %v154_v40 = vmul.f32 1.442695, %v108_v34  ;;  %v484_v45 = vmul.f32 0.5, %v108_v34 }
  0xaf   :  { %271 = vpow2.f32 %v114_v33  ;;  %v105_v42 = vpop.xlane.xlu0 %104 }
  0xb0   :  { %v66_v44 = vmul.f32 1.442695, %v477_v37  ;;  %v109_v46 = vsub.f32 %v37_v11, %v105_v42  ;;  %v118_v49 = vmul.f32 1.442695, %v484_v45 }
  0xb1   :  { %v57_v35 = vpop.xlane.xlu1 %56 }
  0xb2   :  { %v264_v36 = vpop.eup %263  ;;  %v479_v38 = vsub.f32 %v49_v12, %v57_v35  ;;  %v491_v50 = vmul.f32 0.5, %v109_v46  ;;  %v156_v61 = vmul.f32 1.442695, %v109_v46 }
  0xb3   :  { %158 = vadd.xlane.f32.xlu0 %v264_v36 }
  0xb4   :  { %v68_v41 = vmul.f32 1.442695, %v479_v38  ;;  %v120_v52 = vmul.f32 1.442695, %v491_v50 }
  0xb5   :  { %v179_v55 = vpop.permute.xlu1 %178 }
  0xb6   :  { %v266_v43 = vpop.eup %265  ;;  %273 = vpow2.f32 %v68_v41  ;;  %vm187_vm2 = vcmp.eq.s32.totalorder %v33_v59, %v179_v55 }
  0xb7   :  { %275 = vpow2.f32 %v116_v39  ;;  %160 = vadd.xlane.f32.xlu1 %v266_v43  ;;  %v486_v47 = vpop.eup %267  ;;  %v176_v58 = vpop.permute.xlu0 %175  ;;  %v191_v5 = vsel %vm187_vm2, %v463_v23, 0.0 }
  0xb8   :  { %277 = vpow2.f32 %v154_v40  ;;  %v488_v48 = vpop.eup %269  ;;  %vm186_vm0 = vcmp.eq.s32.totalorder %v33_v59, %v176_v58 }
  0xb9   :  { %279 = vpow2.f32 %v66_v44  ;;  %72 = vadd.xlane.f32.xlu0 %v488_v48  ;;  %v272_v51 = vpop.eup %271  ;;  %v182_v62 = vpop.permute.xlu1 %181  ;;  %v190_v0 = vsel %vm186_vm0, %v458_v18, 0.0 }
  0xba   :  { %281 = vpow2.f32 %v118_v49  ;;  %vm188_vm1 = vcmp.eq.s32.totalorder %v33_v59, %v182_v62 }
  0xbb   :  { %70 = vadd.xlane.f32.xlu1 %v486_v47  ;;  %283 = vpow2.f32 %v120_v52  ;;  %v192_v2 = vsel %vm188_vm1, %v108_v34, 0.0 }
  0xbc   :  { %285 = vpow2.f32 %v156_v61 }
  0xbd   :  { %v185_v4 = vpop.permute.xlu1 %184 }
  0xbe   :  { %vm189_vm3 = vcmp.eq.s32.totalorder %v33_v59, %v185_v4 }
  0xbf   :  { %122 = vadd.xlane.f32.xlu1 %v272_v51  ;;  %v193_v6 = vsel %vm189_vm3, %v109_v46, 0.0 }
  0xc0   :  { %v496_v54 = vpop.eup %273 }
  0xc1   :  { %v276_v56 = vpop.eup %275  ;;  %76 = vadd.xlane.f32.xlu0 %v496_v54 }
  0xc2   :  { %v278_v57 = vpop.eup %277 }
  0xc3   :  { %124 = vadd.xlane.f32.xlu1 %v276_v56  ;;  %v499_v60 = vpop.eup %279 }
  0xc4   :  { %v282_v63 = vpop.eup %281 }
  0xc5   :  { %162 = vadd.xlane.f32.xlu0 %v278_v57  ;;  %v284_v1 = vpop.eup %283 }
  0xc6   :  { %v286_v3 = vpop.eup %285 }
  0xc7   :  { %74 = vadd.xlane.f32.xlu1 %v499_v60 }
  0xc9   :  { %194 = vadd.xlane.f32.xlu0 %v190_v0 }
  0xcb   :  { %126 = vadd.xlane.f32.xlu1 %v282_v63 }
  0xcd   :  { %198 = vadd.xlane.f32.xlu0 %v192_v2 }
  0xcf   :  { %128 = vadd.xlane.f32.xlu1 %v284_v1 }
  0xd3   :  { %164 = vadd.xlane.f32.xlu1 %v286_v3 }
  0xd7   :  { %196 = vadd.xlane.f32.xlu1 %v191_v5 }
  0xdb   :  { %200 = vadd.xlane.f32.xlu1 %v193_v6 }
 0x140   :  { %v159_v8 = vpop.xlane.xlu0 %158 }
 0x144   :  { %v161_v7 = vpop.xlane.xlu1 %160 }
 0x146   :  { %v73_v10 = vpop.xlane.xlu0 %72 }
 0x147   :  { %287 = vlog2.f32 %v73_v10 }
 0x148   :  { %v71_v9 = vpop.xlane.xlu1 %70 }
 0x14c   :  { %v123_v11 = vpop.xlane.xlu1 %122 }
 0x14d   :  { %289 = vlog2.f32 %v123_v11 }
 0x14e   :  { %v77_v13 = vpop.xlane.xlu0 %76 }
 0x150   :  { %v125_v12 = vpop.xlane.xlu1 %124 }
 0x151   :  { %291 = vlog2.f32 %v125_v12  ;;  %v288_v17 = vpop.eup %287 }
 0x152   :  { %293 = vlog2.f32 %v159_v8  ;;  %v163_v15 = vpop.xlane.xlu0 %162  ;;  %v89_v26 = vmul.f32 0.6931472, %v288_v17 }
 0x153   :  { %295 = vlog2.f32 %v71_v9 }
 0x154   :  { %297 = vlog2.f32 %v161_v7  ;;  %v75_v14 = vpop.xlane.xlu1 %74  ;;  %v95_v40 = vsub.f32 %v467_v27, %v89_v26 }
 0x155   :  { %299 = vrcp.f32 %v73_v10 }
 0x156   :  { %301 = vlog2.f32 %v75_v14  ;;  %v195_v51 = vpop.xlane.xlu0 %194 }
 0x157   :  { %303 = vrcp.f32 %v71_v9  ;;  %v290_v18 = vpop.eup %289 }
 0x158   :  { %305 = vlog2.f32 %v77_v13  ;;  %v127_v16 = vpop.xlane.xlu1 %126  ;;  %v131_v29 = vmul.f32 0.6931472, %v290_v18 }
 0x159   :  { %307 = vlog2.f32 %v127_v16 }
 0x15a   :  { %309 = vlog2.f32 %v163_v15  ;;  %v138_v41 = vsub.f32 %v470_v28, %v131_v29  ;;  %v199_v9 = vpop.xlane.xlu0 %198 }
 0x15b   :  { %v292_v19 = vpop.eup %291  ;;  %311 = vrcp.f32 %v75_v14 }
 0x15c   :  { %v294_v20 = vpop.eup %293  ;;  %v133_v22 = vmul.f32 0.6931472, %v292_v19  ;;  %v129_v23 = vpop.xlane.xlu1 %128 }
 0x15d   :  { %v296_v24 = vpop.eup %295  ;;  %313 = vlog2.f32 %v129_v23  ;;  %v167_v58 = vmul.f32 0.6931472, %v294_v20 }
 0x15e   :  { %v298_v25 = vpop.eup %297  ;;  %315 = vrcp.f32 %v77_v13  ;;  %v87_v33 = vmul.f32 0.6931472, %v296_v24  ;;  %v139_v34 = vsub.f32 %v474_v31, %v133_v22 }
 0x15f   :  { %v300_v30 = vpop.eup %299  ;;  %v169_v53 = vmul.f32 0.6931472, %v298_v25 }
 0x160   :  { %v302_v32 = vpop.eup %301  ;;  %v165_v35 = vpop.xlane.xlu1 %164  ;;  %v94_v46 = vsub.f32 %v461_v21, %v87_v33  ;;  %v143_v49 = vsub.f32 %v95_v40, %v139_v34  ;;  %v83_v57 = vmul.f32 %v300_v30, %v488_v48  ;;  %v202_v21 = vsub.f32 %v167_v58, %v195_v51 }
 0x161   :  { %v304_v36 = vpop.eup %303  ;;  %317 = vlog2.f32 %v165_v35  ;;  %v91_v42 = vmul.f32 0.6931472, %v302_v32 }
 0x162   :  { %v306_v39 = vpop.eup %305  ;;  %v142_v59 = vsub.f32 %v94_v46, %v138_v41  ;;  %v82_v63 = vmul.f32 %v304_v36, %v486_v47  ;;  %v147_v2 = vmul.f32 %v143_v49, %v83_v57 }
 0x163   :  { %v308_v43 = vpop.eup %307  ;;  %v93_v31 = vmul.f32 0.6931472, %v306_v39  ;;  %v96_v27 = vsub.f32 %v477_v37, %v91_v42 }
 0x164   :  { %v310_v44 = vpop.eup %309  ;;  %v135_v52 = vmul.f32 0.6931472, %v308_v43  ;;  %v197_v55 = vpop.xlane.xlu1 %196  ;;  %v146_v6 = vmul.f32 %v142_v59, %v82_v63 }
 0x165   :  { %v312_v56 = vpop.eup %311  ;;  %v203_v61 = vsub.f32 %v169_v53, %v197_v55  ;;  %v171_v0 = vmul.f32 0.6931472, %v310_v44  ;;  %v97_v48 = vsub.f32 %v479_v38, %v93_v31 }
 0x166   :  { %v140_v28 = vsub.f32 %v484_v45, %v135_v52  ;;  %v84_v3 = vmul.f32 %v312_v56, %v499_v60  ;;  %v206_v47 = vadd.f32 %v147_v2, %v146_v6 }
 0x167   :  { %v314_v62 = vpop.eup %313  ;;  %v215_v8 = vadd.f32 %v203_v61, %v202_v21  ;;  %v204_v11 = vsub.f32 %v171_v0, %v199_v9 }
 0x168   :  { %v316_v1 = vpop.eup %315  ;;  %v144_v4 = vsub.f32 %v96_v27, %v140_v28  ;;  %v137_v5 = vmul.f32 0.6931472, %v314_v62  ;;  %v201_v14 = vpop.xlane.xlu1 %200 }
 0x169   :  { %v85_v10 = vmul.f32 %v316_v1, %v496_v54  ;;  %v216_v17 = vadd.f32 %v215_v8, %v204_v11 }
 0x16a   :  { %v148_v7 = vmul.f32 %v144_v4, %v84_v3  ;;  %v141_v37 = vsub.f32 %v491_v50, %v137_v5 }
 0x16b   :  { %v318_v45 = vpop.eup %317 }
 0x16c   :  { %v145_v12 = vsub.f32 %v97_v48, %v141_v37  ;;  %v173_v13 = vmul.f32 0.6931472, %v318_v45  ;;  %v207_v15 = vadd.f32 %v206_v47, %v148_v7 }
 0x16e   :  { %v149_v60 = vmul.f32 %v145_v12, %v85_v10  ;;  %v205_v16 = vsub.f32 %v173_v13, %v201_v14 }
 0x170   :  { %v217_v18 = vadd.f32 %v216_v17, %v205_v16  ;;  %v208_v38 = vadd.f32 %v207_v15, %v149_v60 }
 0x172   :  { %v218_v19 = vrot.slane %v217_v18, 4  ;;  %v209_v20 = vrot.slane %v208_v38, 4 }
 0x174   :  { %v219_v22 = vadd.f32 %v218_v19, %v217_v18  ;;  %v210_v50 = vadd.f32 %v209_v20, %v208_v38 }
 0x176   :  { %v220_v23 = vrot.slane %v219_v22, 2  ;;  %v211_v24 = vrot.slane %v210_v50, 2 }
 0x178   :  { %v212_v25 = vadd.f32 %v211_v24, %v210_v50  ;;  %v221_v26 = vadd.f32 %v220_v23, %v219_v22 }
 0x17a   :  { %v213_v54 = vrot.slane %v212_v25, 1  ;;  %v222_v29 = vrot.slane %v221_v26, 1 }
 0x17c   :  { %v214_v30 = vadd.f32 %v213_v54, %v212_v25  ;;  %v223_v32 = vadd.f32 %v222_v29, %v221_v26 }
 0x17e   :  { %224 = vst [vmem:[#allocation5] sm:$0x1] %v214_v30  ;;  %225 = vst [vmem:[#allocation6] sm:$0x1] %v223_v32 }
 0x17f   :  { %352 = shalt.err (!%p349_p12)
}
 0x180   :  { %s353_s24 = scalar_lea.hbm %s551_s3, 16 }
 0x181   :  { %p354_p13 = scmp.ne.s32.totalorder %s551_s3, %s353_s24  ;;  %p357_p0 = scmp.lt.u32.totalorder %s353_s24, %s551_s3 }
 0x183   :  { %p359_p1 = pnand %p357_p0, %p354_p13 }
 0x185   :  { %362 = shalt.err (!%p359_p1)
}
 0x186   :  { %235 = dma.vmem_to_hbm [thread:$0]  %s233_s17, 16, %s551_s3, [#allocation4]  }
 0x187   :  { %s363_s5 = scalar_lea.vmem %s516_s19, 16  ;;  %s367_s6 = scalar_lea.vmem %s516_s19, 32 }
 0x188   :  { %p364_p2 = scmp.ne.s32.totalorder %s516_s19, %s363_s5  ;;  %p368_p3 = scmp.lt.s32.totalorder %s516_s19, %s516_s19 }
 0x189   :  { %p369_p4 = scmp.lt.s32.totalorder %s367_s6, %s363_s5 }
 0x18b   :  { %p370_p5 = por %p369_p4, %p368_p3 }
 0x18d   :  { %p371_p6 = pnand %p370_p5, %p364_p2 }
 0x18f   :  { %374 = shalt.err (!%p371_p6)
}
 0x190   :  { %s375_s8 = scalar_lea.hbm %s552_s4, 16 }
 0x191   :  { %p376_p7 = scmp.ne.s32.totalorder %s552_s4, %s375_s8  ;;  %p379_p8 = scmp.lt.u32.totalorder %s375_s8, %s552_s4 }
 0x193   :  { %p381_p9 = pnand %p379_p8, %p376_p7 }
 0x195   :  { %384 = shalt.err (!%p381_p9)
}
 0x196   :  { %245 = dma.vmem_to_hbm [thread:$0]  %s516_s19, 16, %s552_s4, [#allocation7]  }
 0x197   :  { %387 = dma.done.wait [#allocation4], 16  }
 0x198   :  { %388 = vsyncadd [#allocation4], 4294967280 }
 0x199   :  { %389 = dma.done.wait [#allocation7], 16  }
 0x19a   :  { %390 = vsyncadd [#allocation7], 4294967280 }
 0x19b   :  { %252 = vsyncpa [#allocation3], 1 }
 0x19c   :  { %253 = vsyncpa [#allocation4], 1 }
 0x19d   :  { %254 = vsyncpa [#allocation7], 1 }

</bundles_post_ra>
